<compile_context>
chip_gen: v7x
topology: tpu7x:2x2x1
jax: 0.10.0
libtpu: 0.0.40
codegen_flags: <defaults>
</compile_context>

<pallas_src>
import jax
import jax.numpy as jnp
from jax.experimental import pallas as pl
from jax.experimental.pallas import tpu as pltpu


def _shift_lanes(x, s):
    """Circular lane shift with jnp.roll semantics: out[:, l] = x[:, (l - s) % L]."""
    if s == 0:
        return x
    if s > 0:
        return jnp.concatenate([x[:, -s:], x[:, :-s]], axis=1)
    s = -s
    return jnp.concatenate([x[:, s:], x[:, :s]], axis=1)


def _class_sums(x):
    """Per-lane-class (lane % 3) sums of x; returns three (rows, 1) columns.

    Uses class-preserving halving folds (each half-width is a multiple of 3,
    so lane classes are preserved) followed by a small masked reduce, giving
    all three class sums for roughly one add per element.
    """
    w = x.shape[1]
    while w % 6 == 0 and w > 3:
        h = w // 2
        x = x[:, :h] + x[:, h:]
        w = h
    lane_cls = jax.lax.broadcasted_iota(jnp.int32, x.shape, 1) % 3
    zero = jnp.zeros_like(x)
    return [jnp.sum(jnp.where(lane_cls == c, x, zero), axis=1, keepdims=True)
            for c in range(3)]


def _kabsch_stats_kernel(p_ref, q_ref, out_ref):
    """Kabsch statistics for one batch tile.

    p_ref, q_ref: (TB, 3*n_atoms) blocks (predicted / reference) in the natural
      interleaved layout: lane 3*n + c holds coordinate c of atom n; batch on
      sublanes.
    out_ref: (TB, 10) block — column 3*i+j holds the centered cross-covariance
      A[i, j]; column 9 holds E0 = sum|pc|^2 + sum|qc|^2.
    """
    n_atoms = p_ref.shape[1] // 3
    inv_n = jnp.float32(1.0 / n_atoms)

    p = p_ref[...]
    q = q_ref[...]

    # Uncentered cross moments M[i, j] = sum_n p_i[n] * q_j[n].  A lane shift
    # of q by s aligns q_{i-s} under p_i; only lane classes that are free of
    # wraparound contamination are consumed from each shifted product.
    d = _class_sums(p * q)                       # [0]=M00, [1]=M11, [2]=M22
    a1 = _class_sums(p * _shift_lanes(q, 1))     # [1]=M10, [2]=M21
    a2 = _class_sums(p * _shift_lanes(q, 2))     # [2]=M20
    b1 = _class_sums(p * _shift_lanes(q, -1))    # [0]=M01, [1]=M12
    b2 = _class_sums(p * _shift_lanes(q, -2))    # [0]=M02
    m = ((d[0], b1[0], b2[0]),
         (a1[1], d[1], b1[1]),
         (a2[2], a1[2], d[2]))

    sp = _class_sums(p)                          # per-coordinate sums of p
    sq = _class_sums(q)
    norm_p = jnp.sum(p * p, axis=1, keepdims=True)
    norm_q = jnp.sum(q * q, axis=1, keepdims=True)

    # Centered statistics:  A = M - Sp Sq^T / N,
    # E0 = |p|^2 + |q|^2 - (|Sp|^2 + |Sq|^2) / N.
    for i in range(3):
        for j in range(3):
            k = 3 * i + j
            out_ref[:, k:k + 1] = m[i][j] - sp[i] * sq[j] * inv_n
    sum_sq = (sp[0] * sp[0] + sp[1] * sp[1] + sp[2] * sp[2]
              + sq[0] * sq[0] + sq[1] * sq[1] + sq[2] * sq[2])
    out_ref[:, 9:10] = norm_p + norm_q - sum_sq * inv_n


def _vmem_capacity_bytes():
    try:
        return int(pltpu.get_tpu_info().vmem_capacity_bytes)
    except Exception:
        return 64 * 1024 * 1024   # conservative (v7x-sized) fallback


def _pick_batch_tile(batch, lane_width, vmem_capacity):
    """Largest sublane-aligned batch tile that keeps the double-buffered inputs
    plus in-kernel temporaries well inside VMEM and leaves >= 2 grid steps so
    both v7x TensorCores get work."""
    if batch <= 8:
        return batch
    lanes_padded = max(128, ((lane_width + 127) // 128) * 128)
    # 2 inputs x 2 pipeline buffers + ~6 full-width temporaries, f32.
    bytes_per_row = (2 * 2 + 6) * lanes_padded * 4
    budget = vmem_capacity // 4          # ~32 MiB on v5e/v6e, ~16 MiB on v7x
    tb = budget // bytes_per_row
    tb = min(tb, (batch + 1) // 2)       # >= 2 grid steps for v7x megacore
    tb = max(8, (tb // 8) * 8)           # sublane-aligned
    return int(min(tb, batch))


def rmsd_loss(y_prime, y):
    """y_prime, y: (batch, n_atoms, 3) float. Returns the scalar mean RMSD."""
    assert y_prime.shape == y.shape
    batch, n_atoms, dim = y_prime.shape
    assert dim == 3

    lane_width = 3 * n_atoms
    p = jnp.reshape(y_prime.astype(jnp.float32), (batch, lane_width))  # free
    q = jnp.reshape(y.astype(jnp.float32), (batch, lane_width))        # free

    vmem_capacity = _vmem_capacity_bytes()
    tb = _pick_batch_tile(batch, lane_width, vmem_capacity)
    grid = (pl.cdiv(batch, tb),)
    vmem_limit = int(min(vmem_capacity * 3 // 4, 96 * 1024 * 1024))

    stats = pl.pallas_call(
        _kabsch_stats_kernel,
        out_shape=jax.ShapeDtypeStruct((batch, 10), jnp.float32),
        grid_spec=pltpu.PrefetchScalarGridSpec(
            num_scalar_prefetch=0,
            grid=grid,
            in_specs=[
                pl.BlockSpec((tb, lane_width), lambda b: (b, 0)),
                pl.BlockSpec((tb, lane_width), lambda b: (b, 0)),
            ],
            out_specs=pl.BlockSpec((tb, 10), lambda b: (b, 0)),
        ),
        compiler_params=pltpu.CompilerParams(
            dimension_semantics=("parallel",),
            vmem_limit_bytes=vmem_limit,
        ),
    )(p, q)

    a = stats[:, :9].reshape(batch, 3, 3)   # A[b, i, j]
    e0 = stats[:, 9]

    # Closed-form singular values: sqrt of the eigenvalues of the symmetric
    # 3x3 B = A^T A via the trigonometric solution of the characteristic cubic
    # (all elementwise over the batch; no iterative batched SVD).
    b = jnp.einsum('bki,bkj->bij', a, a)
    qd = (b[:, 0, 0] + b[:, 1, 1] + b[:, 2, 2]) / 3.0
    b00 = b[:, 0, 0] - qd
    b11 = b[:, 1, 1] - qd
    b22 = b[:, 2, 2] - qd
    b01 = b[:, 0, 1]
    b02 = b[:, 0, 2]
    b12 = b[:, 1, 2]
    p2 = (b00 * b00 + b11 * b11 + b22 * b22
          + 2.0 * (b01 * b01 + b02 * b02 + b12 * b12))
    pp = jnp.sqrt(jnp.maximum(p2, 0.0) / 6.0)
    safe_p = jnp.where(pp > 0.0, pp, 1.0)
    c00 = b00 / safe_p
    c11 = b11 / safe_p
    c22 = b22 / safe_p
    c01 = b01 / safe_p
    c02 = b02 / safe_p
    c12 = b12 / safe_p
    half_det_c = 0.5 * (c00 * (c11 * c22 - c12 * c12)
                        - c01 * (c01 * c22 - c12 * c02)
                        + c02 * (c01 * c12 - c11 * c02))
    phi = jnp.arccos(jnp.clip(half_det_c, -1.0, 1.0)) / 3.0
    e1 = qd + 2.0 * pp * jnp.cos(phi)
    e3 = qd + 2.0 * pp * jnp.cos(phi + 2.0943951023931953)  # + 2*pi/3
    e2 = 3.0 * qd - e1 - e3
    valid = pp > 0.0
    e1 = jnp.where(valid, e1, qd)
    e2 = jnp.where(valid, e2, qd)
    e3 = jnp.where(valid, e3, qd)
    s1 = jnp.sqrt(jnp.maximum(e1, 0.0))
    s2 = jnp.sqrt(jnp.maximum(e2, 0.0))
    s3 = jnp.sqrt(jnp.maximum(e3, 0.0))     # smallest singular value

    det_a = (a[:, 0, 0] * (a[:, 1, 1] * a[:, 2, 2] - a[:, 1, 2] * a[:, 2, 1])
             - a[:, 0, 1] * (a[:, 1, 0] * a[:, 2, 2] - a[:, 1, 2] * a[:, 2, 0])
             + a[:, 0, 2] * (a[:, 1, 0] * a[:, 2, 1] - a[:, 1, 1] * a[:, 2, 0]))
    # det(A) == 0 implies s3 == 0, so mapping sign 0 -> +1 is harmless.
    sign = jnp.where(det_a < 0.0, jnp.float32(-1.0), jnp.float32(1.0))
    sum_s = s1 + s2 + sign * s3

    msd = jnp.maximum(e0 - 2.0 * sum_s, 0.0) / n_atoms
    return jnp.mean(jnp.sqrt(msd))


def _rmsd_loss_reference(y_prime, y):
    """Pure-JAX literal re-implementation of the Biopython SVDSuperimposer path."""
    batch, n_atoms, _ = y_prime.shape
    total = 0.0
    for bidx in range(batch):
        coords = y_prime[bidx]
        reference = y[bidx]
        av1 = jnp.mean(coords, axis=0)
        av2 = jnp.mean(reference, axis=0)
        c = coords - av1
        r = reference - av2
        a = c.T @ r
        u, dvals, vt = jnp.linalg.svd(a)
        rot = (vt.T @ u.T).T
        flip = jnp.linalg.det(rot) < 0
        vt2 = jnp.where(flip, vt.at[2].multiply(-1.0)[2], vt[2])
        vt_fixed = vt.at[2].set(vt2)
        rot = (vt_fixed.T @ u.T).T
        tran = av2 - av1 @ rot
        transformed = coords @ rot + tran
        diff = transformed - reference
        total = total + jnp.sqrt(jnp.sum(diff * diff) / n_atoms)
    return total / batch


if __name__ == "__main__":
    key = jax.random.PRNGKey(0)
    k1, k2 = jax.random.split(key)
    batch, n_atoms = 2, 16
    y_prime = jax.random.normal(k1, (batch, n_atoms, 3), dtype=jnp.float32)
    y = jax.random.normal(k2, (batch, n_atoms, 3), dtype=jnp.float32)

    loss = jax.jit(rmsd_loss)(y_prime, y)
    jax.block_until_ready(loss)

    ref = _rmsd_loss_reference(y_prime, y)
    assert jnp.allclose(loss, ref, rtol=1e-3, atol=1e-3), (loss, ref)

    print("KERNEL_OK")
</pallas_src>

<mosaic_0001>
module attributes {stable_mosaic.version = 11 : i64} {
  func.func @_kabsch_stats_kernel(%arg0: i32, %arg1: memref<2x48xf32, #tpu.memory_space<vmem>>, %arg2: memref<2x48xf32, #tpu.memory_space<vmem>>, %arg3: memref<2x10xf32, #tpu.memory_space<vmem>>) attributes {dimension_semantics = [#tpu.dimension_semantics<parallel>], iteration_bounds = array<i64: 1>, scalar_prefetch = 0 : i64, scratch_operands = 0 : i64, tpu.core_type = #tpu.core_type<tc>, window_params = [{transform_indices = @transform_0, window_bounds = array<i64: 2, 48>}, {transform_indices = @transform_1, window_bounds = array<i64: 2, 48>}, {transform_indices = @transform_2, window_bounds = array<i64: 2, 10>}]} {
    %c0 = arith.constant 0 : index
    %c0_0 = arith.constant 0 : index
    %0 = vector.load %arg1[%c0, %c0_0] : memref<2x48xf32, #tpu.memory_space<vmem>>, vector<2x48xf32>
    %c0_1 = arith.constant 0 : index
    %c0_2 = arith.constant 0 : index
    %1 = vector.load %arg2[%c0_1, %c0_2] : memref<2x48xf32, #tpu.memory_space<vmem>>, vector<2x48xf32>
    %2 = arith.mulf %0, %1 : vector<2x48xf32>
    %3 = vector.extract_strided_slice %2 {offsets = [0, 0], sizes = [2, 24], strides = [1, 1]} : vector<2x48xf32> to vector<2x24xf32>
    %4 = vector.extract_strided_slice %2 {offsets = [0, 24], sizes = [2, 24], strides = [1, 1]} : vector<2x48xf32> to vector<2x24xf32>
    %5 = arith.addf %3, %4 : vector<2x24xf32>
    %6 = vector.extract_strided_slice %5 {offsets = [0, 0], sizes = [2, 12], strides = [1, 1]} : vector<2x24xf32> to vector<2x12xf32>
    %7 = vector.extract_strided_slice %5 {offsets = [0, 12], sizes = [2, 12], strides = [1, 1]} : vector<2x24xf32> to vector<2x12xf32>
    %8 = arith.addf %6, %7 : vector<2x12xf32>
    %9 = vector.extract_strided_slice %8 {offsets = [0, 0], sizes = [2, 6], strides = [1, 1]} : vector<2x12xf32> to vector<2x6xf32>
    %10 = vector.extract_strided_slice %8 {offsets = [0, 6], sizes = [2, 6], strides = [1, 1]} : vector<2x12xf32> to vector<2x6xf32>
    %11 = arith.addf %9, %10 : vector<2x6xf32>
    %12 = vector.extract_strided_slice %11 {offsets = [0, 0], sizes = [2, 3], strides = [1, 1]} : vector<2x6xf32> to vector<2x3xf32>
    %13 = vector.extract_strided_slice %11 {offsets = [0, 3], sizes = [2, 3], strides = [1, 1]} : vector<2x6xf32> to vector<2x3xf32>
    %14 = arith.addf %12, %13 : vector<2x3xf32>
    %15 = tpu.iota {dimensions = array<i32: 1>} : vector<2x3xi32>
    %c3_i32 = arith.constant 3 : i32
    %c0_i32 = arith.constant 0 : i32
    %16 = arith.cmpi eq, %c3_i32, %c0_i32 : i32
    %c1_i32 = arith.constant 1 : i32
    %17 = arith.select %16, %c1_i32, %c3_i32 : i32
    %18 = vector.broadcast %17 : i32 to vector<2x3xi32>
    %19 = arith.remsi %15, %18 : vector<2x3xi32>
    %c0_i32_3 = arith.constant 0 : i32
    %20 = vector.broadcast %c0_i32_3 : i32 to vector<2x3xi32>
    %21 = arith.cmpi ne, %19, %20 : vector<2x3xi32>
    %c0_i32_4 = arith.constant 0 : i32
    %22 = vector.broadcast %c0_i32_4 : i32 to vector<2x3xi32>
    %23 = arith.cmpi slt, %19, %22 : vector<2x3xi32>
    %c0_i32_5 = arith.constant 0 : i32
    %24 = arith.cmpi slt, %17, %c0_i32_5 : i32
    %25 = vector.broadcast %24 : i1 to vector<2x3xi1>
    %26 = vector.broadcast %25 : vector<2x3xi1> to vector<2x3xi1>
    %27 = arith.xori %23, %26 : vector<2x3xi1>
    %28 = arith.andi %27, %21 : vector<2x3xi1>
    %29 = vector.broadcast %17 : i32 to vector<2x3xi32>
    %30 = arith.addi %19, %29 : vector<2x3xi32>
    %31 = arith.select %28, %30, %19 : vector<2x3xi1>, vector<2x3xi32>
    %cst = arith.constant 0.000000e+00 : f32
    %32 = vector.broadcast %cst : f32 to vector<2x3xf32>
    %c0_i32_6 = arith.constant 0 : i32
    %33 = vector.broadcast %c0_i32_6 : i32 to vector<2x3xi32>
    %34 = arith.cmpi eq, %31, %33 : vector<2x3xi32>
    %35 = arith.select %34, %14, %32 : vector<2x3xi1>, vector<2x3xf32>
    %cst_7 = arith.constant dense<0.000000e+00> : vector<2xf32>
    %36 = vector.multi_reduction <add>, %35, %cst_7 [1] : vector<2x3xf32> to vector<2xf32>
    %37 = vector.shape_cast %36 : vector<2xf32> to vector<2x1xf32>
    %c1_i32_8 = arith.constant 1 : i32
    %38 = vector.broadcast %c1_i32_8 : i32 to vector<2x3xi32>
    %39 = arith.cmpi eq, %31, %38 : vector<2x3xi32>
    %40 = arith.select %39, %14, %32 : vector<2x3xi1>, vector<2x3xf32>
    %cst_9 = arith.constant dense<0.000000e+00> : vector<2xf32>
    %41 = vector.multi_reduction <add>, %40, %cst_9 [1] : vector<2x3xf32> to vector<2xf32>
    %42 = vector.shape_cast %41 : vector<2xf32> to vector<2x1xf32>
    %c2_i32 = arith.constant 2 : i32
    %43 = vector.broadcast %c2_i32 : i32 to vector<2x3xi32>
    %44 = arith.cmpi eq, %31, %43 : vector<2x3xi32>
    %45 = arith.select %44, %14, %32 : vector<2x3xi1>, vector<2x3xf32>
    %cst_10 = arith.constant dense<0.000000e+00> : vector<2xf32>
    %46 = vector.multi_reduction <add>, %45, %cst_10 [1] : vector<2x3xf32> to vector<2xf32>
    %47 = vector.shape_cast %46 : vector<2xf32> to vector<2x1xf32>
    %48 = vector.extract_strided_slice %1 {offsets = [0, 47], sizes = [2, 1], strides = [1, 1]} : vector<2x48xf32> to vector<2x1xf32>
    %49 = vector.extract_strided_slice %1 {offsets = [0, 0], sizes = [2, 47], strides = [1, 1]} : vector<2x48xf32> to vector<2x47xf32>
    %50 = tpu.concatenate %48, %49 in 1 : vector<2x1xf32>, vector<2x47xf32> -> vector<2x48xf32>
    %51 = arith.mulf %0, %50 : vector<2x48xf32>
    %52 = vector.extract_strided_slice %51 {offsets = [0, 0], sizes = [2, 24], strides = [1, 1]} : vector<2x48xf32> to vector<2x24xf32>
    %53 = vector.extract_strided_slice %51 {offsets = [0, 24], sizes = [2, 24], strides = [1, 1]} : vector<2x48xf32> to vector<2x24xf32>
    %54 = arith.addf %52, %53 : vector<2x24xf32>
    %55 = vector.extract_strided_slice %54 {offsets = [0, 0], sizes = [2, 12], strides = [1, 1]} : vector<2x24xf32> to vector<2x12xf32>
    %56 = vector.extract_strided_slice %54 {offsets = [0, 12], sizes = [2, 12], strides = [1, 1]} : vector<2x24xf32> to vector<2x12xf32>
    %57 = arith.addf %55, %56 : vector<2x12xf32>
    %58 = vector.extract_strided_slice %57 {offsets = [0, 0], sizes = [2, 6], strides = [1, 1]} : vector<2x12xf32> to vector<2x6xf32>
    %59 = vector.extract_strided_slice %57 {offsets = [0, 6], sizes = [2, 6], strides = [1, 1]} : vector<2x12xf32> to vector<2x6xf32>
    %60 = arith.addf %58, %59 : vector<2x6xf32>
    %61 = vector.extract_strided_slice %60 {offsets = [0, 0], sizes = [2, 3], strides = [1, 1]} : vector<2x6xf32> to vector<2x3xf32>
    %62 = vector.extract_strided_slice %60 {offsets = [0, 3], sizes = [2, 3], strides = [1, 1]} : vector<2x6xf32> to vector<2x3xf32>
    %63 = arith.addf %61, %62 : vector<2x3xf32>
    %64 = tpu.iota {dimensions = array<i32: 1>} : vector<2x3xi32>
    %c3_i32_11 = arith.constant 3 : i32
    %c0_i32_12 = arith.constant 0 : i32
    %65 = arith.cmpi eq, %c3_i32_11, %c0_i32_12 : i32
    %c1_i32_13 = arith.constant 1 : i32
    %66 = arith.select %65, %c1_i32_13, %c3_i32_11 : i32
    %67 = vector.broadcast %66 : i32 to vector<2x3xi32>
    %68 = arith.remsi %64, %67 : vector<2x3xi32>
    %c0_i32_14 = arith.constant 0 : i32
    %69 = vector.broadcast %c0_i32_14 : i32 to vector<2x3xi32>
    %70 = arith.cmpi ne, %68, %69 : vector<2x3xi32>
    %c0_i32_15 = arith.constant 0 : i32
    %71 = vector.broadcast %c0_i32_15 : i32 to vector<2x3xi32>
    %72 = arith.cmpi slt, %68, %71 : vector<2x3xi32>
    %c0_i32_16 = arith.constant 0 : i32
    %73 = arith.cmpi slt, %66, %c0_i32_16 : i32
    %74 = vector.broadcast %73 : i1 to vector<2x3xi1>
    %75 = vector.broadcast %74 : vector<2x3xi1> to vector<2x3xi1>
    %76 = arith.xori %72, %75 : vector<2x3xi1>
    %77 = arith.andi %76, %70 : vector<2x3xi1>
    %78 = vector.broadcast %66 : i32 to vector<2x3xi32>
    %79 = arith.addi %68, %78 : vector<2x3xi32>
    %80 = arith.select %77, %79, %68 : vector<2x3xi1>, vector<2x3xi32>
    %cst_17 = arith.constant 0.000000e+00 : f32
    %81 = vector.broadcast %cst_17 : f32 to vector<2x3xf32>
    %c1_i32_18 = arith.constant 1 : i32
    %82 = vector.broadcast %c1_i32_18 : i32 to vector<2x3xi32>
    %83 = arith.cmpi eq, %80, %82 : vector<2x3xi32>
    %84 = arith.select %83, %63, %81 : vector<2x3xi1>, vector<2x3xf32>
    %cst_19 = arith.constant dense<0.000000e+00> : vector<2xf32>
    %85 = vector.multi_reduction <add>, %84, %cst_19 [1] : vector<2x3xf32> to vector<2xf32>
    %86 = vector.shape_cast %85 : vector<2xf32> to vector<2x1xf32>
    %c2_i32_20 = arith.constant 2 : i32
    %87 = vector.broadcast %c2_i32_20 : i32 to vector<2x3xi32>
    %88 = arith.cmpi eq, %80, %87 : vector<2x3xi32>
    %89 = arith.select %88, %63, %81 : vector<2x3xi1>, vector<2x3xf32>
    %cst_21 = arith.constant dense<0.000000e+00> : vector<2xf32>
    %90 = vector.multi_reduction <add>, %89, %cst_21 [1] : vector<2x3xf32> to vector<2xf32>
    %91 = vector.shape_cast %90 : vector<2xf32> to vector<2x1xf32>
    %92 = vector.extract_strided_slice %1 {offsets = [0, 46], sizes = [2, 2], strides = [1, 1]} : vector<2x48xf32> to vector<2x2xf32>
    %93 = vector.extract_strided_slice %1 {offsets = [0, 0], sizes = [2, 46], strides = [1, 1]} : vector<2x48xf32> to vector<2x46xf32>
    %94 = tpu.concatenate %92, %93 in 1 : vector<2x2xf32>, vector<2x46xf32> -> vector<2x48xf32>
    %95 = arith.mulf %0, %94 : vector<2x48xf32>
    %96 = vector.extract_strided_slice %95 {offsets = [0, 0], sizes = [2, 24], strides = [1, 1]} : vector<2x48xf32> to vector<2x24xf32>
    %97 = vector.extract_strided_slice %95 {offsets = [0, 24], sizes = [2, 24], strides = [1, 1]} : vector<2x48xf32> to vector<2x24xf32>
    %98 = arith.addf %96, %97 : vector<2x24xf32>
    %99 = vector.extract_strided_slice %98 {offsets = [0, 0], sizes = [2, 12], strides = [1, 1]} : vector<2x24xf32> to vector<2x12xf32>
    %100 = vector.extract_strided_slice %98 {offsets = [0, 12], sizes = [2, 12], strides = [1, 1]} : vector<2x24xf32> to vector<2x12xf32>
    %101 = arith.addf %99, %100 : vector<2x12xf32>
    %102 = vector.extract_strided_slice %101 {offsets = [0, 0], sizes = [2, 6], strides = [1, 1]} : vector<2x12xf32> to vector<2x6xf32>
    %103 = vector.extract_strided_slice %101 {offsets = [0, 6], sizes = [2, 6], strides = [1, 1]} : vector<2x12xf32> to vector<2x6xf32>
    %104 = arith.addf %102, %103 : vector<2x6xf32>
    %105 = vector.extract_strided_slice %104 {offsets = [0, 0], sizes = [2, 3], strides = [1, 1]} : vector<2x6xf32> to vector<2x3xf32>
    %106 = vector.extract_strided_slice %104 {offsets = [0, 3], sizes = [2, 3], strides = [1, 1]} : vector<2x6xf32> to vector<2x3xf32>
    %107 = arith.addf %105, %106 : vector<2x3xf32>
    %108 = tpu.iota {dimensions = array<i32: 1>} : vector<2x3xi32>
    %c3_i32_22 = arith.constant 3 : i32
    %c0_i32_23 = arith.constant 0 : i32
    %109 = arith.cmpi eq, %c3_i32_22, %c0_i32_23 : i32
    %c1_i32_24 = arith.constant 1 : i32
    %110 = arith.select %109, %c1_i32_24, %c3_i32_22 : i32
    %111 = vector.broadcast %110 : i32 to vector<2x3xi32>
    %112 = arith.remsi %108, %111 : vector<2x3xi32>
    %c0_i32_25 = arith.constant 0 : i32
    %113 = vector.broadcast %c0_i32_25 : i32 to vector<2x3xi32>
    %114 = arith.cmpi ne, %112, %113 : vector<2x3xi32>
    %c0_i32_26 = arith.constant 0 : i32
    %115 = vector.broadcast %c0_i32_26 : i32 to vector<2x3xi32>
    %116 = arith.cmpi slt, %112, %115 : vector<2x3xi32>
    %c0_i32_27 = arith.constant 0 : i32
    %117 = arith.cmpi slt, %110, %c0_i32_27 : i32
    %118 = vector.broadcast %117 : i1 to vector<2x3xi1>
    %119 = vector.broadcast %118 : vector<2x3xi1> to vector<2x3xi1>
    %120 = arith.xori %116, %119 : vector<2x3xi1>
    %121 = arith.andi %120, %114 : vector<2x3xi1>
    %122 = vector.broadcast %110 : i32 to vector<2x3xi32>
    %123 = arith.addi %112, %122 : vector<2x3xi32>
    %124 = arith.select %121, %123, %112 : vector<2x3xi1>, vector<2x3xi32>
    %cst_28 = arith.constant 0.000000e+00 : f32
    %125 = vector.broadcast %cst_28 : f32 to vector<2x3xf32>
    %c2_i32_29 = arith.constant 2 : i32
    %126 = vector.broadcast %c2_i32_29 : i32 to vector<2x3xi32>
    %127 = arith.cmpi eq, %124, %126 : vector<2x3xi32>
    %128 = arith.select %127, %107, %125 : vector<2x3xi1>, vector<2x3xf32>
    %cst_30 = arith.constant dense<0.000000e+00> : vector<2xf32>
    %129 = vector.multi_reduction <add>, %128, %cst_30 [1] : vector<2x3xf32> to vector<2xf32>
    %130 = vector.shape_cast %129 : vector<2xf32> to vector<2x1xf32>
    %131 = vector.extract_strided_slice %1 {offsets = [0, 1], sizes = [2, 47], strides = [1, 1]} : vector<2x48xf32> to vector<2x47xf32>
    %132 = vector.extract_strided_slice %1 {offsets = [0, 0], sizes = [2, 1], strides = [1, 1]} : vector<2x48xf32> to vector<2x1xf32>
    %133 = tpu.concatenate %131, %132 in 1 : vector<2x47xf32>, vector<2x1xf32> -> vector<2x48xf32>
    %134 = arith.mulf %0, %133 : vector<2x48xf32>
    %135 = vector.extract_strided_slice %134 {offsets = [0, 0], sizes = [2, 24], strides = [1, 1]} : vector<2x48xf32> to vector<2x24xf32>
    %136 = vector.extract_strided_slice %134 {offsets = [0, 24], sizes = [2, 24], strides = [1, 1]} : vector<2x48xf32> to vector<2x24xf32>
    %137 = arith.addf %135, %136 : vector<2x24xf32>
    %138 = vector.extract_strided_slice %137 {offsets = [0, 0], sizes = [2, 12], strides = [1, 1]} : vector<2x24xf32> to vector<2x12xf32>
    %139 = vector.extract_strided_slice %137 {offsets = [0, 12], sizes = [2, 12], strides = [1, 1]} : vector<2x24xf32> to vector<2x12xf32>
    %140 = arith.addf %138, %139 : vector<2x12xf32>
    %141 = vector.extract_strided_slice %140 {offsets = [0, 0], sizes = [2, 6], strides = [1, 1]} : vector<2x12xf32> to vector<2x6xf32>
    %142 = vector.extract_strided_slice %140 {offsets = [0, 6], sizes = [2, 6], strides = [1, 1]} : vector<2x12xf32> to vector<2x6xf32>
    %143 = arith.addf %141, %142 : vector<2x6xf32>
    %144 = vector.extract_strided_slice %143 {offsets = [0, 0], sizes = [2, 3], strides = [1, 1]} : vector<2x6xf32> to vector<2x3xf32>
    %145 = vector.extract_strided_slice %143 {offsets = [0, 3], sizes = [2, 3], strides = [1, 1]} : vector<2x6xf32> to vector<2x3xf32>
    %146 = arith.addf %144, %145 : vector<2x3xf32>
    %147 = tpu.iota {dimensions = array<i32: 1>} : vector<2x3xi32>
    %c3_i32_31 = arith.constant 3 : i32
    %c0_i32_32 = arith.constant 0 : i32
    %148 = arith.cmpi eq, %c3_i32_31, %c0_i32_32 : i32
    %c1_i32_33 = arith.constant 1 : i32
    %149 = arith.select %148, %c1_i32_33, %c3_i32_31 : i32
    %150 = vector.broadcast %149 : i32 to vector<2x3xi32>
    %151 = arith.remsi %147, %150 : vector<2x3xi32>
    %c0_i32_34 = arith.constant 0 : i32
    %152 = vector.broadcast %c0_i32_34 : i32 to vector<2x3xi32>
    %153 = arith.cmpi ne, %151, %152 : vector<2x3xi32>
    %c0_i32_35 = arith.constant 0 : i32
    %154 = vector.broadcast %c0_i32_35 : i32 to vector<2x3xi32>
    %155 = arith.cmpi slt, %151, %154 : vector<2x3xi32>
    %c0_i32_36 = arith.constant 0 : i32
    %156 = arith.cmpi slt, %149, %c0_i32_36 : i32
    %157 = vector.broadcast %156 : i1 to vector<2x3xi1>
    %158 = vector.broadcast %157 : vector<2x3xi1> to vector<2x3xi1>
    %159 = arith.xori %155, %158 : vector<2x3xi1>
    %160 = arith.andi %159, %153 : vector<2x3xi1>
    %161 = vector.broadcast %149 : i32 to vector<2x3xi32>
    %162 = arith.addi %151, %161 : vector<2x3xi32>
    %163 = arith.select %160, %162, %151 : vector<2x3xi1>, vector<2x3xi32>
    %cst_37 = arith.constant 0.000000e+00 : f32
    %164 = vector.broadcast %cst_37 : f32 to vector<2x3xf32>
    %c0_i32_38 = arith.constant 0 : i32
    %165 = vector.broadcast %c0_i32_38 : i32 to vector<2x3xi32>
    %166 = arith.cmpi eq, %163, %165 : vector<2x3xi32>
    %167 = arith.select %166, %146, %164 : vector<2x3xi1>, vector<2x3xf32>
    %cst_39 = arith.constant dense<0.000000e+00> : vector<2xf32>
    %168 = vector.multi_reduction <add>, %167, %cst_39 [1] : vector<2x3xf32> to vector<2xf32>
    %169 = vector.shape_cast %168 : vector<2xf32> to vector<2x1xf32>
    %c1_i32_40 = arith.constant 1 : i32
    %170 = vector.broadcast %c1_i32_40 : i32 to vector<2x3xi32>
    %171 = arith.cmpi eq, %163, %170 : vector<2x3xi32>
    %172 = arith.select %171, %146, %164 : vector<2x3xi1>, vector<2x3xf32>
    %cst_41 = arith.constant dense<0.000000e+00> : vector<2xf32>
    %173 = vector.multi_reduction <add>, %172, %cst_41 [1] : vector<2x3xf32> to vector<2xf32>
    %174 = vector.shape_cast %173 : vector<2xf32> to vector<2x1xf32>
    %175 = vector.extract_strided_slice %1 {offsets = [0, 2], sizes = [2, 46], strides = [1, 1]} : vector<2x48xf32> to vector<2x46xf32>
    %176 = vector.extract_strided_slice %1 {offsets = [0, 0], sizes = [2, 2], strides = [1, 1]} : vector<2x48xf32> to vector<2x2xf32>
    %177 = tpu.concatenate %175, %176 in 1 : vector<2x46xf32>, vector<2x2xf32> -> vector<2x48xf32>
    %178 = arith.mulf %0, %177 : vector<2x48xf32>
    %179 = vector.extract_strided_slice %178 {offsets = [0, 0], sizes = [2, 24], strides = [1, 1]} : vector<2x48xf32> to vector<2x24xf32>
    %180 = vector.extract_strided_slice %178 {offsets = [0, 24], sizes = [2, 24], strides = [1, 1]} : vector<2x48xf32> to vector<2x24xf32>
    %181 = arith.addf %179, %180 : vector<2x24xf32>
    %182 = vector.extract_strided_slice %181 {offsets = [0, 0], sizes = [2, 12], strides = [1, 1]} : vector<2x24xf32> to vector<2x12xf32>
    %183 = vector.extract_strided_slice %181 {offsets = [0, 12], sizes = [2, 12], strides = [1, 1]} : vector<2x24xf32> to vector<2x12xf32>
    %184 = arith.addf %182, %183 : vector<2x12xf32>
    %185 = vector.extract_strided_slice %184 {offsets = [0, 0], sizes = [2, 6], strides = [1, 1]} : vector<2x12xf32> to vector<2x6xf32>
    %186 = vector.extract_strided_slice %184 {offsets = [0, 6], sizes = [2, 6], strides = [1, 1]} : vector<2x12xf32> to vector<2x6xf32>
    %187 = arith.addf %185, %186 : vector<2x6xf32>
    %188 = vector.extract_strided_slice %187 {offsets = [0, 0], sizes = [2, 3], strides = [1, 1]} : vector<2x6xf32> to vector<2x3xf32>
    %189 = vector.extract_strided_slice %187 {offsets = [0, 3], sizes = [2, 3], strides = [1, 1]} : vector<2x6xf32> to vector<2x3xf32>
    %190 = arith.addf %188, %189 : vector<2x3xf32>
    %191 = tpu.iota {dimensions = array<i32: 1>} : vector<2x3xi32>
    %c3_i32_42 = arith.constant 3 : i32
    %c0_i32_43 = arith.constant 0 : i32
    %192 = arith.cmpi eq, %c3_i32_42, %c0_i32_43 : i32
    %c1_i32_44 = arith.constant 1 : i32
    %193 = arith.select %192, %c1_i32_44, %c3_i32_42 : i32
    %194 = vector.broadcast %193 : i32 to vector<2x3xi32>
    %195 = arith.remsi %191, %194 : vector<2x3xi32>
    %c0_i32_45 = arith.constant 0 : i32
    %196 = vector.broadcast %c0_i32_45 : i32 to vector<2x3xi32>
    %197 = arith.cmpi ne, %195, %196 : vector<2x3xi32>
    %c0_i32_46 = arith.constant 0 : i32
    %198 = vector.broadcast %c0_i32_46 : i32 to vector<2x3xi32>
    %199 = arith.cmpi slt, %195, %198 : vector<2x3xi32>
    %c0_i32_47 = arith.constant 0 : i32
    %200 = arith.cmpi slt, %193, %c0_i32_47 : i32
    %201 = vector.broadcast %200 : i1 to vector<2x3xi1>
    %202 = vector.broadcast %201 : vector<2x3xi1> to vector<2x3xi1>
    %203 = arith.xori %199, %202 : vector<2x3xi1>
    %204 = arith.andi %203, %197 : vector<2x3xi1>
    %205 = vector.broadcast %193 : i32 to vector<2x3xi32>
    %206 = arith.addi %195, %205 : vector<2x3xi32>
    %207 = arith.select %204, %206, %195 : vector<2x3xi1>, vector<2x3xi32>
    %cst_48 = arith.constant 0.000000e+00 : f32
    %208 = vector.broadcast %cst_48 : f32 to vector<2x3xf32>
    %c0_i32_49 = arith.constant 0 : i32
    %209 = vector.broadcast %c0_i32_49 : i32 to vector<2x3xi32>
    %210 = arith.cmpi eq, %207, %209 : vector<2x3xi32>
    %211 = arith.select %210, %190, %208 : vector<2x3xi1>, vector<2x3xf32>
    %cst_50 = arith.constant dense<0.000000e+00> : vector<2xf32>
    %212 = vector.multi_reduction <add>, %211, %cst_50 [1] : vector<2x3xf32> to vector<2xf32>
    %213 = vector.shape_cast %212 : vector<2xf32> to vector<2x1xf32>
    %214 = vector.extract_strided_slice %0 {offsets = [0, 0], sizes = [2, 24], strides = [1, 1]} : vector<2x48xf32> to vector<2x24xf32>
    %215 = vector.extract_strided_slice %0 {offsets = [0, 24], sizes = [2, 24], strides = [1, 1]} : vector<2x48xf32> to vector<2x24xf32>
    %216 = arith.addf %214, %215 : vector<2x24xf32>
    %217 = vector.extract_strided_slice %216 {offsets = [0, 0], sizes = [2, 12], strides = [1, 1]} : vector<2x24xf32> to vector<2x12xf32>
    %218 = vector.extract_strided_slice %216 {offsets = [0, 12], sizes = [2, 12], strides = [1, 1]} : vector<2x24xf32> to vector<2x12xf32>
    %219 = arith.addf %217, %218 : vector<2x12xf32>
    %220 = vector.extract_strided_slice %219 {offsets = [0, 0], sizes = [2, 6], strides = [1, 1]} : vector<2x12xf32> to vector<2x6xf32>
    %221 = vector.extract_strided_slice %219 {offsets = [0, 6], sizes = [2, 6], strides = [1, 1]} : vector<2x12xf32> to vector<2x6xf32>
    %222 = arith.addf %220, %221 : vector<2x6xf32>
    %223 = vector.extract_strided_slice %222 {offsets = [0, 0], sizes = [2, 3], strides = [1, 1]} : vector<2x6xf32> to vector<2x3xf32>
    %224 = vector.extract_strided_slice %222 {offsets = [0, 3], sizes = [2, 3], strides = [1, 1]} : vector<2x6xf32> to vector<2x3xf32>
    %225 = arith.addf %223, %224 : vector<2x3xf32>
    %226 = tpu.iota {dimensions = array<i32: 1>} : vector<2x3xi32>
    %c3_i32_51 = arith.constant 3 : i32
    %c0_i32_52 = arith.constant 0 : i32
    %227 = arith.cmpi eq, %c3_i32_51, %c0_i32_52 : i32
    %c1_i32_53 = arith.constant 1 : i32
    %228 = arith.select %227, %c1_i32_53, %c3_i32_51 : i32
    %229 = vector.broadcast %228 : i32 to vector<2x3xi32>
    %230 = arith.remsi %226, %229 : vector<2x3xi32>
    %c0_i32_54 = arith.constant 0 : i32
    %231 = vector.broadcast %c0_i32_54 : i32 to vector<2x3xi32>
    %232 = arith.cmpi ne, %230, %231 : vector<2x3xi32>
    %c0_i32_55 = arith.constant 0 : i32
    %233 = vector.broadcast %c0_i32_55 : i32 to vector<2x3xi32>
    %234 = arith.cmpi slt, %230, %233 : vector<2x3xi32>
    %c0_i32_56 = arith.constant 0 : i32
    %235 = arith.cmpi slt, %228, %c0_i32_56 : i32
    %236 = vector.broadcast %235 : i1 to vector<2x3xi1>
    %237 = vector.broadcast %236 : vector<2x3xi1> to vector<2x3xi1>
    %238 = arith.xori %234, %237 : vector<2x3xi1>
    %239 = arith.andi %238, %232 : vector<2x3xi1>
    %240 = vector.broadcast %228 : i32 to vector<2x3xi32>
    %241 = arith.addi %230, %240 : vector<2x3xi32>
    %242 = arith.select %239, %241, %230 : vector<2x3xi1>, vector<2x3xi32>
    %cst_57 = arith.constant 0.000000e+00 : f32
    %243 = vector.broadcast %cst_57 : f32 to vector<2x3xf32>
    %c0_i32_58 = arith.constant 0 : i32
    %244 = vector.broadcast %c0_i32_58 : i32 to vector<2x3xi32>
    %245 = arith.cmpi eq, %242, %244 : vector<2x3xi32>
    %246 = arith.select %245, %225, %243 : vector<2x3xi1>, vector<2x3xf32>
    %cst_59 = arith.constant dense<0.000000e+00> : vector<2xf32>
    %247 = vector.multi_reduction <add>, %246, %cst_59 [1] : vector<2x3xf32> to vector<2xf32>
    %248 = vector.shape_cast %247 : vector<2xf32> to vector<2x1xf32>
    %c1_i32_60 = arith.constant 1 : i32
    %249 = vector.broadcast %c1_i32_60 : i32 to vector<2x3xi32>
    %250 = arith.cmpi eq, %242, %249 : vector<2x3xi32>
    %251 = arith.select %250, %225, %243 : vector<2x3xi1>, vector<2x3xf32>
    %cst_61 = arith.constant dense<0.000000e+00> : vector<2xf32>
    %252 = vector.multi_reduction <add>, %251, %cst_61 [1] : vector<2x3xf32> to vector<2xf32>
    %253 = vector.shape_cast %252 : vector<2xf32> to vector<2x1xf32>
    %c2_i32_62 = arith.constant 2 : i32
    %254 = vector.broadcast %c2_i32_62 : i32 to vector<2x3xi32>
    %255 = arith.cmpi eq, %242, %254 : vector<2x3xi32>
    %256 = arith.select %255, %225, %243 : vector<2x3xi1>, vector<2x3xf32>
    %cst_63 = arith.constant dense<0.000000e+00> : vector<2xf32>
    %257 = vector.multi_reduction <add>, %256, %cst_63 [1] : vector<2x3xf32> to vector<2xf32>
    %258 = vector.shape_cast %257 : vector<2xf32> to vector<2x1xf32>
    %259 = vector.extract_strided_slice %1 {offsets = [0, 0], sizes = [2, 24], strides = [1, 1]} : vector<2x48xf32> to vector<2x24xf32>
    %260 = vector.extract_strided_slice %1 {offsets = [0, 24], sizes = [2, 24], strides = [1, 1]} : vector<2x48xf32> to vector<2x24xf32>
    %261 = arith.addf %259, %260 : vector<2x24xf32>
    %262 = vector.extract_strided_slice %261 {offsets = [0, 0], sizes = [2, 12], strides = [1, 1]} : vector<2x24xf32> to vector<2x12xf32>
    %263 = vector.extract_strided_slice %261 {offsets = [0, 12], sizes = [2, 12], strides = [1, 1]} : vector<2x24xf32> to vector<2x12xf32>
    %264 = arith.addf %262, %263 : vector<2x12xf32>
    %265 = vector.extract_strided_slice %264 {offsets = [0, 0], sizes = [2, 6], strides = [1, 1]} : vector<2x12xf32> to vector<2x6xf32>
    %266 = vector.extract_strided_slice %264 {offsets = [0, 6], sizes = [2, 6], strides = [1, 1]} : vector<2x12xf32> to vector<2x6xf32>
    %267 = arith.addf %265, %266 : vector<2x6xf32>
    %268 = vector.extract_strided_slice %267 {offsets = [0, 0], sizes = [2, 3], strides = [1, 1]} : vector<2x6xf32> to vector<2x3xf32>
    %269 = vector.extract_strided_slice %267 {offsets = [0, 3], sizes = [2, 3], strides = [1, 1]} : vector<2x6xf32> to vector<2x3xf32>
    %270 = arith.addf %268, %269 : vector<2x3xf32>
    %271 = tpu.iota {dimensions = array<i32: 1>} : vector<2x3xi32>
    %c3_i32_64 = arith.constant 3 : i32
    %c0_i32_65 = arith.constant 0 : i32
    %272 = arith.cmpi eq, %c3_i32_64, %c0_i32_65 : i32
    %c1_i32_66 = arith.constant 1 : i32
    %273 = arith.select %272, %c1_i32_66, %c3_i32_64 : i32
    %274 = vector.broadcast %273 : i32 to vector<2x3xi32>
    %275 = arith.remsi %271, %274 : vector<2x3xi32>
    %c0_i32_67 = arith.constant 0 : i32
    %276 = vector.broadcast %c0_i32_67 : i32 to vector<2x3xi32>
    %277 = arith.cmpi ne, %275, %276 : vector<2x3xi32>
    %c0_i32_68 = arith.constant 0 : i32
    %278 = vector.broadcast %c0_i32_68 : i32 to vector<2x3xi32>
    %279 = arith.cmpi slt, %275, %278 : vector<2x3xi32>
    %c0_i32_69 = arith.constant 0 : i32
    %280 = arith.cmpi slt, %273, %c0_i32_69 : i32
    %281 = vector.broadcast %280 : i1 to vector<2x3xi1>
    %282 = vector.broadcast %281 : vector<2x3xi1> to vector<2x3xi1>
    %283 = arith.xori %279, %282 : vector<2x3xi1>
    %284 = arith.andi %283, %277 : vector<2x3xi1>
    %285 = vector.broadcast %273 : i32 to vector<2x3xi32>
    %286 = arith.addi %275, %285 : vector<2x3xi32>
    %287 = arith.select %284, %286, %275 : vector<2x3xi1>, vector<2x3xi32>
    %cst_70 = arith.constant 0.000000e+00 : f32
    %288 = vector.broadcast %cst_70 : f32 to vector<2x3xf32>
    %c0_i32_71 = arith.constant 0 : i32
    %289 = vector.broadcast %c0_i32_71 : i32 to vector<2x3xi32>
    %290 = arith.cmpi eq, %287, %289 : vector<2x3xi32>
    %291 = arith.select %290, %270, %288 : vector<2x3xi1>, vector<2x3xf32>
    %cst_72 = arith.constant dense<0.000000e+00> : vector<2xf32>
    %292 = vector.multi_reduction <add>, %291, %cst_72 [1] : vector<2x3xf32> to vector<2xf32>
    %293 = vector.shape_cast %292 : vector<2xf32> to vector<2x1xf32>
    %c1_i32_73 = arith.constant 1 : i32
    %294 = vector.broadcast %c1_i32_73 : i32 to vector<2x3xi32>
    %295 = arith.cmpi eq, %287, %294 : vector<2x3xi32>
    %296 = arith.select %295, %270, %288 : vector<2x3xi1>, vector<2x3xf32>
    %cst_74 = arith.constant dense<0.000000e+00> : vector<2xf32>
    %297 = vector.multi_reduction <add>, %296, %cst_74 [1] : vector<2x3xf32> to vector<2xf32>
    %298 = vector.shape_cast %297 : vector<2xf32> to vector<2x1xf32>
    %c2_i32_75 = arith.constant 2 : i32
    %299 = vector.broadcast %c2_i32_75 : i32 to vector<2x3xi32>
    %300 = arith.cmpi eq, %287, %299 : vector<2x3xi32>
    %301 = arith.select %300, %270, %288 : vector<2x3xi1>, vector<2x3xf32>
    %cst_76 = arith.constant dense<0.000000e+00> : vector<2xf32>
    %302 = vector.multi_reduction <add>, %301, %cst_76 [1] : vector<2x3xf32> to vector<2xf32>
    %303 = vector.shape_cast %302 : vector<2xf32> to vector<2x1xf32>
    %304 = arith.mulf %0, %0 : vector<2x48xf32>
    %cst_77 = arith.constant dense<0.000000e+00> : vector<2xf32>
    %305 = vector.multi_reduction <add>, %304, %cst_77 [1] : vector<2x48xf32> to vector<2xf32>
    %306 = vector.shape_cast %305 : vector<2xf32> to vector<2x1xf32>
    %307 = arith.mulf %1, %1 : vector<2x48xf32>
    %cst_78 = arith.constant dense<0.000000e+00> : vector<2xf32>
    %308 = vector.multi_reduction <add>, %307, %cst_78 [1] : vector<2x48xf32> to vector<2xf32>
    %309 = vector.shape_cast %308 : vector<2xf32> to vector<2x1xf32>
    %310 = arith.mulf %248, %293 : vector<2x1xf32>
    %cst_79 = arith.constant 6.250000e-02 : f32
    %311 = vector.broadcast %cst_79 : f32 to vector<2x1xf32>
    %312 = arith.mulf %310, %311 : vector<2x1xf32>
    %313 = arith.subf %37, %312 : vector<2x1xf32>
    %c0_80 = arith.constant 0 : index
    %c0_81 = arith.constant 0 : index
    %314 = vector.load %arg3[%c0_80, %c0_81] : memref<2x10xf32, #tpu.memory_space<vmem>>, vector<2x1xf32>
    tpu.vector_store %arg3[%c0_80, %c0_81], %313 {strides = array<i32>} : memref<2x10xf32, #tpu.memory_space<vmem>>, vector<2x1xf32>,
    %315 = arith.mulf %248, %298 : vector<2x1xf32>
    %cst_82 = arith.constant 6.250000e-02 : f32
    %316 = vector.broadcast %cst_82 : f32 to vector<2x1xf32>
    %317 = arith.mulf %315, %316 : vector<2x1xf32>
    %318 = arith.subf %169, %317 : vector<2x1xf32>
    %c0_83 = arith.constant 0 : index
    %c1 = arith.constant 1 : index
    %319 = vector.load %arg3[%c0_83, %c1] : memref<2x10xf32, #tpu.memory_space<vmem>>, vector<2x1xf32>
    tpu.vector_store %arg3[%c0_83, %c1], %318 {strides = array<i32>} : memref<2x10xf32, #tpu.memory_space<vmem>>, vector<2x1xf32>,
    %320 = arith.mulf %248, %303 : vector<2x1xf32>
    %cst_84 = arith.constant 6.250000e-02 : f32
    %321 = vector.broadcast %cst_84 : f32 to vector<2x1xf32>
    %322 = arith.mulf %320, %321 : vector<2x1xf32>
    %323 = arith.subf %213, %322 : vector<2x1xf32>
    %c0_85 = arith.constant 0 : index
    %c2 = arith.constant 2 : index
    %324 = vector.load %arg3[%c0_85, %c2] : memref<2x10xf32, #tpu.memory_space<vmem>>, vector<2x1xf32>
    tpu.vector_store %arg3[%c0_85, %c2], %323 {strides = array<i32>} : memref<2x10xf32, #tpu.memory_space<vmem>>, vector<2x1xf32>,
    %325 = arith.mulf %253, %293 : vector<2x1xf32>
    %cst_86 = arith.constant 6.250000e-02 : f32
    %326 = vector.broadcast %cst_86 : f32 to vector<2x1xf32>
    %327 = arith.mulf %325, %326 : vector<2x1xf32>
    %328 = arith.subf %86, %327 : vector<2x1xf32>
    %c0_87 = arith.constant 0 : index
    %c3 = arith.constant 3 : index
    %329 = vector.load %arg3[%c0_87, %c3] : memref<2x10xf32, #tpu.memory_space<vmem>>, vector<2x1xf32>
    tpu.vector_store %arg3[%c0_87, %c3], %328 {strides = array<i32>} : memref<2x10xf32, #tpu.memory_space<vmem>>, vector<2x1xf32>,
    %330 = arith.mulf %253, %298 : vector<2x1xf32>
    %cst_88 = arith.constant 6.250000e-02 : f32
    %331 = vector.broadcast %cst_88 : f32 to vector<2x1xf32>
    %332 = arith.mulf %330, %331 : vector<2x1xf32>
    %333 = arith.subf %42, %332 : vector<2x1xf32>
    %c0_89 = arith.constant 0 : index
    %c4 = arith.constant 4 : index
    %334 = vector.load %arg3[%c0_89, %c4] : memref<2x10xf32, #tpu.memory_space<vmem>>, vector<2x1xf32>
    tpu.vector_store %arg3[%c0_89, %c4], %333 {strides = array<i32>} : memref<2x10xf32, #tpu.memory_space<vmem>>, vector<2x1xf32>,
    %335 = arith.mulf %253, %303 : vector<2x1xf32>
    %cst_90 = arith.constant 6.250000e-02 : f32
    %336 = vector.broadcast %cst_90 : f32 to vector<2x1xf32>
    %337 = arith.mulf %335, %336 : vector<2x1xf32>
    %338 = arith.subf %174, %337 : vector<2x1xf32>
    %c0_91 = arith.constant 0 : index
    %c5 = arith.constant 5 : index
    %339 = vector.load %arg3[%c0_91, %c5] : memref<2x10xf32, #tpu.memory_space<vmem>>, vector<2x1xf32>
    tpu.vector_store %arg3[%c0_91, %c5], %338 {strides = array<i32>} : memref<2x10xf32, #tpu.memory_space<vmem>>, vector<2x1xf32>,
    %340 = arith.mulf %258, %293 : vector<2x1xf32>
    %cst_92 = arith.constant 6.250000e-02 : f32
    %341 = vector.broadcast %cst_92 : f32 to vector<2x1xf32>
    %342 = arith.mulf %340, %341 : vector<2x1xf32>
    %343 = arith.subf %130, %342 : vector<2x1xf32>
    %c0_93 = arith.constant 0 : index
    %c6 = arith.constant 6 : index
    %344 = vector.load %arg3[%c0_93, %c6] : memref<2x10xf32, #tpu.memory_space<vmem>>, vector<2x1xf32>
    tpu.vector_store %arg3[%c0_93, %c6], %343 {strides = array<i32>} : memref<2x10xf32, #tpu.memory_space<vmem>>, vector<2x1xf32>,
    %345 = arith.mulf %258, %298 : vector<2x1xf32>
    %cst_94 = arith.constant 6.250000e-02 : f32
    %346 = vector.broadcast %cst_94 : f32 to vector<2x1xf32>
    %347 = arith.mulf %345, %346 : vector<2x1xf32>
    %348 = arith.subf %91, %347 : vector<2x1xf32>
    %c0_95 = arith.constant 0 : index
    %c7 = arith.constant 7 : index
    %349 = vector.load %arg3[%c0_95, %c7] : memref<2x10xf32, #tpu.memory_space<vmem>>, vector<2x1xf32>
    tpu.vector_store %arg3[%c0_95, %c7], %348 {strides = array<i32>} : memref<2x10xf32, #tpu.memory_space<vmem>>, vector<2x1xf32>,
    %350 = arith.mulf %258, %303 : vector<2x1xf32>
    %cst_96 = arith.constant 6.250000e-02 : f32
    %351 = vector.broadcast %cst_96 : f32 to vector<2x1xf32>
    %352 = arith.mulf %350, %351 : vector<2x1xf32>
    %353 = arith.subf %47, %352 : vector<2x1xf32>
    %c0_97 = arith.constant 0 : index
    %c8 = arith.constant 8 : index
    %354 = vector.load %arg3[%c0_97, %c8] : memref<2x10xf32, #tpu.memory_space<vmem>>, vector<2x1xf32>
    tpu.vector_store %arg3[%c0_97, %c8], %353 {strides = array<i32>} : memref<2x10xf32, #tpu.memory_space<vmem>>, vector<2x1xf32>,
    %355 = arith.mulf %248, %248 : vector<2x1xf32>
    %356 = arith.mulf %253, %253 : vector<2x1xf32>
    %357 = arith.addf %355, %356 : vector<2x1xf32>
    %358 = arith.mulf %258, %258 : vector<2x1xf32>
    %359 = arith.addf %357, %358 : vector<2x1xf32>
    %360 = arith.mulf %293, %293 : vector<2x1xf32>
    %361 = arith.addf %359, %360 : vector<2x1xf32>
    %362 = arith.mulf %298, %298 : vector<2x1xf32>
    %363 = arith.addf %361, %362 : vector<2x1xf32>
    %364 = arith.mulf %303, %303 : vector<2x1xf32>
    %365 = arith.addf %363, %364 : vector<2x1xf32>
    %366 = arith.addf %306, %309 : vector<2x1xf32>
    %cst_98 = arith.constant 6.250000e-02 : f32
    %367 = vector.broadcast %cst_98 : f32 to vector<2x1xf32>
    %368 = arith.mulf %365, %367 : vector<2x1xf32>
    %369 = arith.subf %366, %368 : vector<2x1xf32>
    %c0_99 = arith.constant 0 : index
    %c9 = arith.constant 9 : index
    %370 = vector.load %arg3[%c0_99, %c9] : memref<2x10xf32, #tpu.memory_space<vmem>>, vector<2x1xf32>
    tpu.vector_store %arg3[%c0_99, %c9], %369 {strides = array<i32>} : memref<2x10xf32, #tpu.memory_space<vmem>>, vector<2x1xf32>,
    return
  }
  func.func @transform_0(%arg0: i32) -> (i32, i32) {
    %c0_i32 = arith.constant 0 : i32
    %c0_i32_0 = arith.constant 0 : i32
    return %arg0, %c0_i32 : i32, i32
  }
  func.func @transform_1(%arg0: i32) -> (i32, i32) {
    %c0_i32 = arith.constant 0 : i32
    %c0_i32_0 = arith.constant 0 : i32
    return %arg0, %c0_i32 : i32, i32
  }
  func.func @transform_2(%arg0: i32) -> (i32, i32) {
    %c0_i32 = arith.constant 0 : i32
    %c0_i32_0 = arith.constant 0 : i32
    return %arg0, %c0_i32 : i32, i32
  }
}

</mosaic_0001>

<bundles_post_ra>
// kernel: rmsd_loss.1
= control target key start
LH: loop header
LB: loop body
LE: loop exit
PB: predicated region body
PF: predicated region fallthrough
CT: control target
= control target key end

     0   :  { %s360_s11 = smov 126   ;;  %s361_s12 = smov 127   ;;  %vm182_vm0 = vcmask 375808   ;;  %vm145_vm1 = vcmask 384000   ;;  %vm75_vm2 = vcmask 7168   ;;  %vm112_vm3 = vcmask 15360   ;;  %s510_s1 = inlined_call_operand.vmem [shape: f32[2,48], index: 1, kind: input, shape index: {}]   ;;  %s511_s0 = inlined_call_operand.vmem [shape: f32[2,48], index: 0, kind: input, shape index: {}]   ;;  %s512_s2 = inlined_call_operand.vmem [shape: f32[2,10], index: 2, kind: output, shape index: {}]  }
   0x1   :  { %v390_v0 = vld [vmem:[%s510_s1] sm:$0x3]  ;;  %s362_s13 = smov 46   ;;  %s363_s14 = smov 47   ;;  %v34_v53 = vlaneseq  ;;  %vm54_vm9 = vcmask 17408   ;;  %vm273_vm11 = vcmask 386048  }
   0x2   :  { %176 = vrot.lane.b32.xlu1 %v390_v0, %s360_s11  ;;  %139 = vrot.lane.b32.xlu0 %v390_v0, %s361_s12  ;;  %s364_s15 = smov 1   ;;  %s365_s16 = smov 81   ;;  %v403_v1 = vld [vmem:[%s511_s0] sm:$0x3]  ;;  %vm284_vm12 = vcmask 1024   ;;  %vm289_vm13 = vcmask 9224  }
   0x3   :  { %s366_s1 = smov 2   ;;  %s367_s17 = smov 82   ;;  %v13_v2 = vmul.f32 %v390_v0, %v403_v1  ;;  %v35_v54 = vand.u32 127, %v34_v53  ;;  %v272_v53 = vmul.f32 %v403_v1, %v403_v1  ;;  %vm294_vm14 = vcmask 17424  }
   0x4   :  { %s368_s20 = smov 104   ;;  %s369_s0 = smov 116   ;;  %vm299_vm15 = vcmask 25624  }
   0x5   :  { %s370_s21 = smov 122   ;;  %s371_s22 = smov 125   ;;  %v418_v55 = vmul.u32.u64.low 2863311531, %v35_v54  ;;  %v419_v56 = vmul.u32.u64.high 2863311531, %v35_v54, %v418_v55 }
   0x6   :  { %179 = vrot.lane.b32.xlu1 %v390_v0, %s362_s13  ;;  %142 = vrot.lane.b32.xlu0 %v390_v0, %s363_s14 }
   0x7   :  { %v42_v58 = vshrl.u32 %v419_v56, 1 }
   0x9   :  { %v43_v60 = vmul.u32 3, %v42_v58 }
   0xa   :  { %72 = vrot.lane.b32.xlu1 %v390_v0, %s364_s15  ;;  %69 = vrot.lane.b32.xlu0 %v390_v0, %s365_s16 }
   0xb   :  { %v44_v63 = vsub.s32 %v35_v54, %v43_v60 }
   0xd   :  { %vm47_vm4 = vcmp.ne.s32.totalorder %v44_v63, 0  ;;  %vm48_vm5 = vcmp.lt.s32.totalorder %v44_v63, 0 }
   0xe   :  { %109 = vrot.lane.b32.xlu1 %v390_v0, %s366_s1  ;;  %106 = vrot.lane.b32.xlu0 %v390_v0, %s367_s17  ;;  %vm49_vm6 = vmand %vm48_vm5, %vm47_vm4  ;;  %vm324_vm4 = vcmask 66624   ;;  %vm340_vm5 = vcmask 74824  }
  0x12   :  { %210 = vrot.lane.b32.xlu0 %v403_v1, %s368_s20  ;;  %241 = vrot.lane.b32.xlu1 %v390_v0, %s368_s20 }
  0x16   :  { %15 = vrot.lane.b32.xlu0 %v13_v2, %s368_s20 }
  0x74   :  { %v177_v3 = vpop.permute.xlu1 %176  ;;  %v140_v4 = vpop.permute.xlu0 %139 }
  0x78   :  { %v180_v5 = vpop.permute.xlu1 %179  ;;  %v143_v6 = vpop.permute.xlu0 %142 }
  0x79   :  { %v183_v7 = vsel %vm182_vm0, %v177_v3, %v180_v5  ;;  %v146_v8 = vsel %vm145_vm1, %v140_v4, %v143_v6  ;;  %v50_v4 = vadd.s32 3, %v44_v63  ;;  %vm304_vm0 = vcmask 33824  }
  0x7a   :  { %v184_v9 = vmul.f32 %v183_v7, %v403_v1  ;;  %v147_v10 = vmul.f32 %v146_v8, %v403_v1  ;;  %vm309_vm1 = vcmask 42024  }
  0x7b   :  { %v425_v8 = vsel %vm49_vm6, %v50_v4, %v44_v63 }
  0x7c   :  { %v73_v11 = vpop.permute.xlu1 %72  ;;  %v70_v12 = vpop.permute.xlu0 %69  ;;  %149 = vrot.lane.b32.xlu1 %v147_v10, %s368_s20  ;;  %186 = vrot.lane.b32.xlu0 %v184_v9, %s368_s20  ;;  %vm58_vm7 = vcmp.eq.s32.totalorder %v425_v8, 1  ;;  %vm52_vm8 = vcmp.eq.s32.totalorder %v425_v8, 0  ;;  %vm63_vm10 = vcmp.eq.s32.totalorder %v425_v8, 2 }
  0x7d   :  { %v76_v13 = vsel %vm75_vm2, %v70_v12, %v73_v11  ;;  %vm314_vm2 = vcmask 50224  }
  0x7e   :  { %v77_v14 = vmul.f32 %v76_v13, %v403_v1 }
  0x80   :  { %v110_v15 = vpop.permute.xlu1 %109  ;;  %v107_v16 = vpop.permute.xlu0 %106  ;;  %79 = vrot.lane.b32.xlu1 %v77_v14, %s368_s20 }
  0x81   :  { %v113_v17 = vsel %vm112_vm3, %v107_v16, %v110_v15  ;;  %vm319_vm3 = vcmask 58424  }
  0x82   :  { %v114_v18 = vmul.f32 %v113_v17, %v403_v1 }
  0x84   :  { %v211_v19 = vpop.permute.xlu0 %210  ;;  %116 = vrot.lane.b32.xlu0 %v114_v18, %s368_s20  ;;  %v242_v20 = vpop.permute.xlu1 %241 }
  0x85   :  { %v213_v21 = vadd.f32 %v211_v19, %v403_v1  ;;  %v244_v22 = vadd.f32 %v242_v20, %v390_v0 }
  0x87   :  { %215 = vrot.lane.b32.xlu1 %v213_v21, %s369_s0 }
  0x88   :  { %246 = vrot.lane.b32.xlu0 %v244_v22, %s369_s0  ;;  %v16_v23 = vpop.permute.xlu0 %15 }
  0x89   :  { %v18_v24 = vadd.f32 %v16_v23, %v13_v2 }
  0x8b   :  { %20 = vrot.lane.b32.xlu1 %v18_v24, %s369_s0 }
  0xee   :  { %v150_v25 = vpop.permute.xlu1 %149  ;;  %v187_v26 = vpop.permute.xlu0 %186 }
  0xef   :  { %v152_v27 = vadd.f32 %v150_v25, %v147_v10  ;;  %v189_v28 = vadd.f32 %v187_v26, %v184_v9 }
  0xf1   :  { %154 = vrot.lane.b32.xlu0 %v152_v27, %s369_s0  ;;  %191 = vrot.lane.b32.xlu1 %v189_v28, %s369_s0 }
  0xf2   :  { %v80_v29 = vpop.permute.xlu1 %79 }
  0xf3   :  { %v82_v30 = vadd.f32 %v80_v29, %v77_v14 }
  0xf5   :  { %84 = vrot.lane.b32.xlu0 %v82_v30, %s369_s0 }
  0xf6   :  { %v117_v31 = vpop.permute.xlu0 %116 }
  0xf7   :  { %v119_v32 = vadd.f32 %v117_v31, %v114_v18 }
  0xf9   :  { %v216_v33 = vpop.permute.xlu1 %215  ;;  %121 = vrot.lane.b32.xlu1 %v119_v32, %s369_s0 }
  0xfa   :  { %v247_v34 = vpop.permute.xlu0 %246  ;;  %v218_v38 = vadd.f32 %v216_v33, %v213_v21 }
  0xfb   :  { %v249_v35 = vadd.f32 %v247_v34, %v244_v22 }
  0xfd   :  { %v21_v36 = vpop.permute.xlu1 %20  ;;  %251 = vrot.lane.b32.xlu1 %v249_v35, %s370_s21 }
  0xfe   :  { %v23_v37 = vadd.f32 %v21_v36, %v18_v24 }
 0x100   :  { %25 = vrot.lane.b32.xlu0 %v23_v37, %s370_s21 }
 0x104   :  { %220 = vrot.lane.b32.xlu0 %v218_v38, %s370_s21 }
 0x163   :  { %v155_v39 = vpop.permute.xlu0 %154  ;;  %v192_v41 = vpop.permute.xlu1 %191 }
 0x164   :  { %v157_v40 = vadd.f32 %v155_v39, %v152_v27  ;;  %v194_v42 = vadd.f32 %v192_v41, %v189_v28 }
 0x166   :  { %159 = vrot.lane.b32.xlu1 %v157_v40, %s370_s21 }
 0x167   :  { %v85_v43 = vpop.permute.xlu0 %84 }
 0x168   :  { %v87_v45 = vadd.f32 %v85_v43, %v82_v30 }
 0x16a   :  { %196 = vrot.lane.b32.xlu1 %v194_v42, %s370_s21 }
 0x16b   :  { %v122_v44 = vpop.permute.xlu1 %121 }
 0x16c   :  { %v124_v47 = vadd.f32 %v122_v44, %v119_v32 }
 0x16e   :  { %89 = vrot.lane.b32.xlu1 %v87_v45, %s370_s21 }
 0x16f   :  { %v252_v46 = vpop.permute.xlu1 %251 }
 0x170   :  { %v254_v48 = vadd.f32 %v252_v46, %v249_v35 }
 0x172   :  { %256 = vrot.lane.b32.xlu0 %v254_v48, %s371_s22  ;;  %126 = vrot.lane.b32.xlu1 %v124_v47, %s370_s21  ;;  %v26_v49 = vpop.permute.xlu0 %25 }
 0x173   :  { %v28_v50 = vadd.f32 %v26_v49, %v23_v37 }
 0x176   :  { %30 = vrot.lane.b32.xlu1 %v28_v50, %s371_s22  ;;  %v221_v51 = vpop.permute.xlu0 %220 }
 0x177   :  { %v223_v52 = vadd.f32 %v221_v51, %v218_v38 }
 0x17a   :  { %225 = vrot.lane.b32.xlu1 %v223_v52, %s371_s22 }
 0x1d8   :  { %v160_v57 = vpop.permute.xlu1 %159 }
 0x1d9   :  { %v162_v3 = vadd.f32 %v160_v57, %v157_v40 }
 0x1dc   :  { %v197_v59 = vpop.permute.xlu1 %196 }
 0x1dd   :  { %v199_v6 = vadd.f32 %v197_v59, %v194_v42 }
 0x1e0   :  { %v90_v61 = vpop.permute.xlu1 %89 }
 0x1e1   :  { %v92_v62 = vadd.f32 %v90_v61, %v87_v45 }
 0x1e3   :  { %94 = vrot.lane.b32.xlu0 %v92_v62, %s371_s22 }
 0x1e4   :  { %v127_v2 = vpop.permute.xlu1 %126  ;;  %v257_v7 = vpop.permute.xlu0 %256 }
 0x1e5   :  { %v129_v10 = vadd.f32 %v127_v2, %v124_v47  ;;  %v259_v11 = vadd.f32 %v257_v7, %v254_v48  ;;  %v277_v47 = vmul.f32 %v390_v0, %v390_v0  ;;  %v274_v0 = vsel %vm273_vm11, %v272_v53, 0.0 }
 0x1e7   :  { %164 = vrot.lane.b32.xlu0 %v162_v3, %s371_s22  ;;  %v260_v16 = vsel %vm52_vm8, %v259_v11, 0.0  ;;  %v264_v24 = vsel %vm58_vm7, %v259_v11, 0.0  ;;  %v268_v46 = vsel %vm63_vm10, %v259_v11, 0.0 }
 0x1e8   :  { %v31_v5 = vpop.permute.xlu1 %30  ;;  %v261_v17 = vsel %vm54_vm9, %v260_v16, 0.0  ;;  %v265_v25 = vsel %vm54_vm9, %v264_v24, 0.0  ;;  %v269_v49 = vsel %vm54_vm9, %v268_v46, 0.0 }
 0x1e9   :  { %v33_v15 = vadd.f32 %v31_v5, %v28_v50 }
 0x1eb   :  { %201 = vrot.lane.b32.xlu0 %v199_v6, %s371_s22  ;;  %v59_v18 = vsel %vm58_vm7, %v33_v15, 0.0  ;;  %v53_v26 = vsel %vm52_vm8, %v33_v15, 0.0  ;;  %v64_v28 = vsel %vm63_vm10, %v33_v15, 0.0 }
 0x1ec   :  { %v226_v9 = vpop.permute.xlu1 %225  ;;  %v60_v19 = vsel %vm54_vm9, %v59_v18, 0.0  ;;  %v55_v27 = vsel %vm54_vm9, %v53_v26, 0.0  ;;  %v65_v29 = vsel %vm54_vm9, %v64_v28, 0.0 }
 0x1ed   :  { %v228_v12 = vadd.f32 %v226_v9, %v223_v52  ;;  %v278_v52 = vsel %vm273_vm11, %v277_v47, 0.0 }
 0x1ef   :  { %131 = vrot.lane.b32.xlu0 %v129_v10, %s371_s22  ;;  %v233_v13 = vsel %vm58_vm7, %v228_v12, 0.0  ;;  %v229_v20 = vsel %vm52_vm8, %v228_v12, 0.0  ;;  %v237_v22 = vsel %vm63_vm10, %v228_v12, 0.0 }
 0x1f0   :  { %v234_v14 = vsel %vm54_vm9, %v233_v13, 0.0  ;;  %v230_v21 = vsel %vm54_vm9, %v229_v20, 0.0  ;;  %v238_v23 = vsel %vm54_vm9, %v237_v22, 0.0 }
 0x1f1   :  { %235 = vadd.xlane.f32.xlu1 %v234_v14 }
 0x1f5   :  { %262 = vadd.xlane.f32.xlu1 %v261_v17 }
 0x1f9   :  { %61 = vadd.xlane.f32.xlu1 %v60_v19 }
 0x20e   :  { %231 = vadd.xlane.f32.xlu0 %v230_v21 }
 0x212   :  { %239 = vadd.xlane.f32.xlu0 %v238_v23 }
 0x216   :  { %266 = vadd.xlane.f32.xlu0 %v265_v25 }
 0x21a   :  { %56 = vadd.xlane.f32.xlu0 %v55_v27 }
 0x21e   :  { %66 = vadd.xlane.f32.xlu0 %v65_v29 }
 0x255   :  { %v95_v30 = vpop.permute.xlu0 %94 }
 0x256   :  { %v97_v31 = vadd.f32 %v95_v30, %v92_v62 }
 0x258   :  { %v102_v32 = vsel %vm63_vm10, %v97_v31, 0.0  ;;  %v98_v33 = vsel %vm58_vm7, %v97_v31, 0.0 }
 0x259   :  { %v165_v34 = vpop.permute.xlu0 %164  ;;  %v103_v35 = vsel %vm54_vm9, %v102_v32, 0.0  ;;  %v99_v36 = vsel %vm54_vm9, %v98_v33, 0.0 }
 0x25a   :  { %v167_v37 = vadd.f32 %v165_v34, %v162_v3  ;;  %104 = vadd.xlane.f32.xlu0 %v103_v35  ;;  %100 = vadd.xlane.f32.xlu1 %v99_v36 }
 0x25c   :  { %v168_v38 = vsel %vm52_vm8, %v167_v37, 0.0  ;;  %v172_v51 = vsel %vm58_vm7, %v167_v37, 0.0 }
 0x25d   :  { %v202_v39 = vpop.permute.xlu0 %201  ;;  %v169_v40 = vsel %vm54_vm9, %v168_v38, 0.0  ;;  %v173_v54 = vsel %vm54_vm9, %v172_v51, 0.0 }
 0x25e   :  { %v204_v41 = vadd.f32 %v202_v39, %v199_v6  ;;  %170 = vadd.xlane.f32.xlu1 %v169_v40 }
 0x260   :  { %v205_v42 = vsel %vm52_vm8, %v204_v41, 0.0 }
 0x261   :  { %v132_v43 = vpop.permute.xlu0 %131  ;;  %v206_v44 = vsel %vm54_vm9, %v205_v42, 0.0 }
 0x262   :  { %v134_v45 = vadd.f32 %v132_v43, %v129_v10  ;;  %207 = vadd.xlane.f32.xlu1 %v206_v44 }
 0x264   :  { %v135_v48 = vsel %vm63_vm10, %v134_v45, 0.0 }
 0x265   :  { %v136_v50 = vsel %vm54_vm9, %v135_v48, 0.0 }
 0x266   :  { %270 = vadd.xlane.f32.xlu1 %v269_v49  ;;  %137 = vadd.xlane.f32.xlu0 %v136_v50 }
 0x26a   :  { %174 = vadd.xlane.f32.xlu0 %v173_v54  ;;  %279 = vadd.xlane.f32.xlu1 %v278_v52 }
 0x26e   :  { %275 = vadd.xlane.f32.xlu0 %v274_v0 }
 0x27e   :  { %v236_v55 = vpop.xlane.xlu1 %235 }
 0x27f   :  { %v327_v58 = vmul.f32 %v236_v55, %v236_v55 }
 0x282   :  { %v263_v60 = vpop.xlane.xlu1 %262 }
 0x283   :  { %v331_v3 = vmul.f32 %v263_v60, %v263_v60  ;;  %v296_v20 = vmul.f32 %v263_v60, %v236_v55 }
 0x285   :  { %v297_v30 = vmul.f32 0.0625, %v296_v20 }
 0x286   :  { %v62_v10 = vpop.xlane.xlu1 %61 }
 0x29b   :  { %v232_v56 = vpop.xlane.xlu0 %231 }
 0x29c   :  { %v326_v57 = vmul.f32 %v232_v56, %v232_v56  ;;  %v281_v2 = vmul.f32 %v263_v60, %v232_v56 }
 0x29e   :  { %v328_v61 = vadd.f32 %v327_v58, %v326_v57  ;;  %v282_v6 = vmul.f32 0.0625, %v281_v2 }
 0x29f   :  { %v240_v59 = vpop.xlane.xlu0 %239 }
 0x2a0   :  { %v329_v62 = vmul.f32 %v240_v59, %v240_v59  ;;  %v311_v29 = vmul.f32 %v263_v60, %v240_v59 }
 0x2a2   :  { %v330_v63 = vadd.f32 %v329_v62, %v328_v61  ;;  %v312_v40 = vmul.f32 0.0625, %v311_v29 }
 0x2a3   :  { %v267_v4 = vpop.xlane.xlu0 %266 }
 0x2a4   :  { %v333_v5 = vmul.f32 %v267_v4, %v267_v4  ;;  %v332_v1 = vadd.f32 %v331_v3, %v330_v63  ;;  %v286_v11 = vmul.f32 %v267_v4, %v232_v56  ;;  %v301_v19 = vmul.f32 %v267_v4, %v236_v55 }
 0x2a5   :  { %v316_v31 = vmul.f32 %v267_v4, %v240_v59 }
 0x2a6   :  { %v334_v8 = vadd.f32 %v333_v5, %v332_v1  ;;  %v287_v13 = vmul.f32 0.0625, %v286_v11  ;;  %v302_v26 = vmul.f32 0.0625, %v301_v19 }
 0x2a7   :  { %v57_v7 = vpop.xlane.xlu0 %56  ;;  %v317_v41 = vmul.f32 0.0625, %v316_v31 }
 0x2a8   :  { %v283_v9 = vsub.f32 %v57_v7, %v282_v6  ;;  %v303_v38 = vsub.f32 %v62_v10, %v302_v26 }
 0x2aa   :  { %285 = vst.msk [vmem:[%s512_s2] sm:$0x3] %vm284_vm12, %v283_v9 }
 0x2ab   :  { %v67_v14 = vpop.xlane.xlu0 %66 }
 0x2e7   :  { %v101_v12 = vpop.xlane.xlu1 %100  ;;  %v105_v17 = vpop.xlane.xlu0 %104 }
 0x2e8   :  { %v298_v36 = vsub.f32 %v101_v12, %v297_v30  ;;  %v318_v47 = vsub.f32 %v105_v17, %v317_v41 }
 0x2eb   :  { %v171_v15 = vpop.xlane.xlu1 %170 }
 0x2ec   :  { %v288_v16 = vsub.f32 %v171_v15, %v287_v13 }
 0x2ee   :  { %290 = vst.msk [vmem:[%s512_s2] sm:$0x3] %vm289_vm13, %v288_v16 }
 0x2ef   :  { %v208_v18 = vpop.xlane.xlu1 %207 }
 0x2f3   :  { %v271_v21 = vpop.xlane.xlu1 %270  ;;  %v138_v22 = vpop.xlane.xlu0 %137 }
 0x2f4   :  { %v291_v23 = vmul.f32 %v271_v21, %v232_v56  ;;  %v335_v24 = vmul.f32 %v271_v21, %v271_v21  ;;  %v306_v25 = vmul.f32 %v271_v21, %v236_v55  ;;  %v321_v28 = vmul.f32 %v271_v21, %v240_v59 }
 0x2f5   :  { %v313_v44 = vsub.f32 %v138_v22, %v312_v40 }
 0x2f6   :  { %v292_v27 = vmul.f32 0.0625, %v291_v23  ;;  %v307_v32 = vmul.f32 0.0625, %v306_v25  ;;  %v336_v35 = vadd.f32 %v335_v24, %v334_v8  ;;  %v322_v39 = vmul.f32 0.0625, %v321_v28 }
 0x2f7   :  { %v175_v33 = vpop.xlane.xlu0 %174  ;;  %v280_v37 = vpop.xlane.xlu1 %279 }
 0x2f8   :  { %v293_v34 = vsub.f32 %v208_v18, %v292_v27  ;;  %v308_v42 = vsub.f32 %v175_v33, %v307_v32  ;;  %v338_v45 = vmul.f32 0.0625, %v336_v35  ;;  %v323_v48 = vsub.f32 %v67_v14, %v322_v39 }
 0x2fa   :  { %295 = vst.msk [vmem:[%s512_s2] sm:$0x3] %vm294_vm14, %v293_v34 }
 0x2fb   :  { %300 = vst.msk [vmem:[%s512_s2] sm:$0x3] %vm299_vm15, %v298_v36  ;;  %v276_v43 = vpop.xlane.xlu0 %275 }
 0x2fc   :  { %305 = vst.msk [vmem:[%s512_s2] sm:$0x3] %vm304_vm0, %v303_v38  ;;  %v337_v46 = vadd.f32 %v280_v37, %v276_v43 }
 0x2fd   :  { %310 = vst.msk [vmem:[%s512_s2] sm:$0x3] %vm309_vm1, %v308_v42 }
 0x2fe   :  { %315 = vst.msk [vmem:[%s512_s2] sm:$0x3] %vm314_vm2, %v313_v44  ;;  %v339_v49 = vsub.f32 %v337_v46, %v338_v45 }
 0x2ff   :  { %320 = vst.msk [vmem:[%s512_s2] sm:$0x3] %vm319_vm3, %v318_v47 }
 0x300   :  { %325 = vst.msk [vmem:[%s512_s2] sm:$0x3] %vm324_vm4, %v323_v48 }
 0x301   :  { %341 = vst.msk [vmem:[%s512_s2] sm:$0x3] %vm340_vm5, %v339_v49 }

</bundles_post_ra>
